<compile_context>
chip_gen: v6e
topology: v6e:2x2x1
jax: 0.10.0
libtpu: 0.0.40
codegen_flags: <defaults>
</compile_context>

<pallas_src>
import functools

import jax
import jax.numpy as jnp
from jax.experimental import pallas as pl
from jax.experimental.pallas import tpu as pltpu

LN_EPS = 1e-5  # PyTorch nn.LayerNorm default eps


def _round_up(x: int, m: int) -> int:
    return (x + m - 1) // m * m


def ft_head_kernel(x_ref, gamma_ref, beta_ref, w_ref, b_ref, o_ref, h_ref,
                   *, d_in: int):
    """One (batch tile, output-column tile) step.

    h_ref is a per-batch-tile VMEM scratch holding relu(layernorm(x)); it is
    filled once at the first column tile and reused for the rest.  `d_in` is
    the real (unpadded) feature count used as the LayerNorm divisor.
    """
    # --- relu(LayerNorm(x)) : computed once per batch tile ------------------
    @pl.when(pl.program_id(1) == 0)
    def _():
        x = x_ref[...].astype(jnp.float32)                       # (TM, Dp_in)
        inv_d = jnp.float32(1.0 / d_in)
        # Two independent lane reductions -> E[x], E[x^2] (single pass).
        mean = jnp.sum(x, axis=-1, keepdims=True) * inv_d        # (TM, 1)
        mean_sq = jnp.sum(x * x, axis=-1, keepdims=True) * inv_d # (TM, 1)
        var = jnp.maximum(mean_sq - mean * mean, 0.0)
        r = jax.lax.rsqrt(var + LN_EPS)                          # EUP
        h = (x - mean) * r * gamma_ref[...].astype(jnp.float32) \
            + beta_ref[...].astype(jnp.float32)
        h_ref[...] = jnp.maximum(h, 0.0)                         # ReLU

    # --- Linear: lane-dense MXU matmul on this column tile ------------------
    y = jnp.dot(h_ref[...], w_ref[...].astype(jnp.float32),
                preferred_element_type=jnp.float32)              # (TM, TN)
    o_ref[...] = (y + b_ref[...].astype(jnp.float32)).astype(o_ref.dtype)


def ft_prediction_head(x, gamma, beta, w, b, *, block_m: int = 256,
                       block_n: int = 512):
    """FTPredictionHead forward.

    x: (N, D_in); gamma/beta: (1, D_in); w: (D_in, D_out); b: (1, D_out).
    Returns (N, D_out).
    """
    n, d_in = x.shape
    d_out = w.shape[1]

    # Pad features to 128-lane multiples; pad batch to a sublane-aligned tile.
    d_in_p = _round_up(d_in, 128)
    tm = min(block_m, _round_up(n, 8))        # multiple of 8 (f32 sublanes)
    n_p = _round_up(n, tm)
    d_out_p = _round_up(d_out, 128)
    tn = min(block_n, d_out_p)                # output-column tile (<= 512)
    d_out_p = _round_up(d_out_p, tn)

    xp = jnp.pad(x, ((0, n_p - n), (0, d_in_p - d_in)))
    gp = jnp.pad(gamma, ((0, 0), (0, d_in_p - d_in)))
    bp = jnp.pad(beta, ((0, 0), (0, d_in_p - d_in)))
    wp = jnp.pad(w, ((0, d_in_p - d_in), (0, d_out_p - d_out)))
    bbp = jnp.pad(b, ((0, 0), (0, d_out_p - d_out)))

    grid = (n_p // tm, d_out_p // tn)

    cost = pl.CostEstimate(
        flops=2 * n_p * d_in_p * d_out_p + 8 * n_p * d_in_p,
        transcendentals=n_p,                       # one rsqrt per row
        bytes_accessed=(xp.size + wp.size + gp.size + bp.size + bbp.size
                        + n_p * d_out_p) * 4,
    )

    # TODO(synk): for huge D_in (K >> VMEM) add a K grid axis with a float32
    # accumulator; not needed for FT-Transformer hidden sizes.
    out = pl.pallas_call(
        functools.partial(ft_head_kernel, d_in=d_in),
        out_shape=jax.ShapeDtypeStruct((n_p, d_out_p), x.dtype),
        grid_spec=pltpu.PrefetchScalarGridSpec(
            num_scalar_prefetch=0,
            grid=grid,
            in_specs=[
                # x: tiled along batch, constant over column axis -> no re-DMA
                # between consecutive column steps of the same batch tile.
                pl.BlockSpec((tm, d_in_p), lambda i, j: (i, 0)),
                # LayerNorm params: constant index maps -> VMEM-resident.
                pl.BlockSpec((1, d_in_p), lambda i, j: (0, 0)),
                pl.BlockSpec((1, d_in_p), lambda i, j: (0, 0)),
                # Linear weight / bias: tiled along output columns.
                pl.BlockSpec((d_in_p, tn), lambda i, j: (0, j)),
                pl.BlockSpec((1, tn), lambda i, j: (0, j)),
            ],
            out_specs=pl.BlockSpec((tm, tn), lambda i, j: (i, j)),
            scratch_shapes=[pltpu.VMEM((tm, d_in_p), jnp.float32)],
        ),
        compiler_params=pltpu.CompilerParams(
            # Batch tiles independent -> shardable across v7x's 2 TCs.
            # Column axis reuses the per-batch-tile scratch -> "arbitrary".
            dimension_semantics=("parallel", "arbitrary")),
        cost_estimate=cost,
    )(xp, gp, bp, wp, bbp)

    return out[:n, :d_out]


def reference(x, gamma, beta, w, b):
    xf = x.astype(jnp.float32)
    mean = jnp.mean(xf, axis=-1, keepdims=True)
    var = jnp.mean((xf - mean) ** 2, axis=-1, keepdims=True)
    h = (xf - mean) / jnp.sqrt(var + LN_EPS) * gamma + beta
    h = jnp.maximum(h, 0.0)
    return (h @ w + b).astype(x.dtype)


if __name__ == "__main__":
    N, D_IN, D_OUT = 8, 32, 16

    key = jax.random.PRNGKey(0)
    kx, kw, kb = jax.random.split(key, 3)

    x = jax.random.normal(kx, (N, D_IN), dtype=jnp.float32)

    # Deterministic parameter init (mirrors nn.LayerNorm / nn.Linear shapes).
    gamma = jnp.ones((1, D_IN), dtype=jnp.float32)     # LayerNorm weight
    beta = jnp.zeros((1, D_IN), dtype=jnp.float32)     # LayerNorm bias
    bound = 1.0 / (D_IN ** 0.5)                        # nn.Linear default init
    w = jax.random.uniform(kw, (D_IN, D_OUT), jnp.float32, -bound, bound)
    b = jax.random.uniform(kb, (1, D_OUT), jnp.float32, -bound, bound)

    out = ft_prediction_head(x, gamma, beta, w, b)
    jax.block_until_ready(out)

    ref = reference(x, gamma, beta, w, b)
    assert out.shape == (N, D_OUT)
    assert jnp.allclose(out, ref, atol=1e-4, rtol=1e-4), "mismatch vs reference"

    print("KERNEL_OK")
</pallas_src>

<mosaic_0001>
module attributes {stable_mosaic.version = 11 : i64} {
  func.func @ft_head_kernel(%arg0: i32, %arg1: i32, %arg2: memref<8x128xf32, #tpu.memory_space<vmem>>, %arg3: memref<1x128xf32, #tpu.memory_space<vmem>>, %arg4: memref<1x128xf32, #tpu.memory_space<vmem>>, %arg5: memref<128x128xf32, #tpu.memory_space<vmem>>, %arg6: memref<1x128xf32, #tpu.memory_space<vmem>>, %arg7: memref<8x128xf32, #tpu.memory_space<vmem>>, %arg8: memref<8x128xf32, #tpu.memory_space<vmem>>) attributes {dimension_semantics = [#tpu.dimension_semantics<parallel>, #tpu.dimension_semantics<arbitrary>], iteration_bounds = array<i64: 1, 1>, scalar_prefetch = 0 : i64, scratch_operands = 1 : i64, tpu.core_type = #tpu.core_type<tc>, window_params = [{transform_indices = @transform_0, window_bounds = array<i64: 8, 128>}, {pipeline_mode = #tpu.pipeline_mode<synchronous>, transform_indices = @transform_1, window_bounds = array<i64: 1, 128>}, {pipeline_mode = #tpu.pipeline_mode<synchronous>, transform_indices = @transform_2, window_bounds = array<i64: 1, 128>}, {transform_indices = @transform_3, window_bounds = array<i64: 128, 128>}, {transform_indices = @transform_4, window_bounds = array<i64: 1, 128>}, {transform_indices = @transform_5, window_bounds = array<i64: 8, 128>}]} {
    %c0_i32 = arith.constant 0 : i32
    %0 = arith.cmpi eq, %arg1, %c0_i32 : i32
    %1 = arith.extui %0 : i1 to i32
    %c0_i32_0 = arith.constant 0 : i32
    %2 = arith.cmpi ne, %1, %c0_i32_0 : i32
    scf.if %2 {
      %c0_8 = arith.constant 0 : index
      %c0_9 = arith.constant 0 : index
      %10 = vector.load %arg2[%c0_8, %c0_9] : memref<8x128xf32, #tpu.memory_space<vmem>>, vector<8x128xf32>
      %cst_10 = arith.constant dense<0.000000e+00> : vector<8xf32>
      %11 = vector.multi_reduction <add>, %10, %cst_10 [1] : vector<8x128xf32> to vector<8xf32>
      %12 = vector.shape_cast %11 : vector<8xf32> to vector<8x1xf32>
      %cst_11 = arith.constant 3.125000e-02 : f32
      %13 = vector.broadcast %cst_11 : f32 to vector<8x1xf32>
      %14 = arith.mulf %12, %13 : vector<8x1xf32>
      %15 = arith.mulf %10, %10 : vector<8x128xf32>
      %cst_12 = arith.constant dense<0.000000e+00> : vector<8xf32>
      %16 = vector.multi_reduction <add>, %15, %cst_12 [1] : vector<8x128xf32> to vector<8xf32>
      %17 = vector.shape_cast %16 : vector<8xf32> to vector<8x1xf32>
      %cst_13 = arith.constant 3.125000e-02 : f32
      %18 = vector.broadcast %cst_13 : f32 to vector<8x1xf32>
      %19 = arith.mulf %17, %18 : vector<8x1xf32>
      %20 = arith.mulf %14, %14 : vector<8x1xf32>
      %21 = arith.subf %19, %20 : vector<8x1xf32>
      %cst_14 = arith.constant 0.000000e+00 : f32
      %22 = vector.broadcast %cst_14 : f32 to vector<8x1xf32>
      %23 = arith.maximumf %21, %22 : vector<8x1xf32>
      %cst_15 = arith.constant 9.99999974E-6 : f32
      %24 = vector.broadcast %cst_15 : f32 to vector<8x1xf32>
      %25 = arith.addf %23, %24 : vector<8x1xf32>
      %26 = math.rsqrt %25 : vector<8x1xf32>
      %27 = vector.broadcast %14 : vector<8x1xf32> to vector<8x128xf32>
      %28 = arith.subf %10, %27 : vector<8x128xf32>
      %29 = vector.broadcast %26 : vector<8x1xf32> to vector<8x128xf32>
      %30 = arith.mulf %28, %29 : vector<8x128xf32>
      %c0_16 = arith.constant 0 : index
      %c0_17 = arith.constant 0 : index
      %31 = vector.load %arg3[%c0_16, %c0_17] : memref<1x128xf32, #tpu.memory_space<vmem>>, vector<1x128xf32>
      %32 = vector.broadcast %31 : vector<1x128xf32> to vector<8x128xf32>
      %33 = arith.mulf %30, %32 : vector<8x128xf32>
      %c0_18 = arith.constant 0 : index
      %c0_19 = arith.constant 0 : index
      %34 = vector.load %arg4[%c0_18, %c0_19] : memref<1x128xf32, #tpu.memory_space<vmem>>, vector<1x128xf32>
      %35 = vector.broadcast %34 : vector<1x128xf32> to vector<8x128xf32>
      %36 = arith.addf %33, %35 : vector<8x128xf32>
      %cst_20 = arith.constant 0.000000e+00 : f32
      %37 = vector.broadcast %cst_20 : f32 to vector<8x128xf32>
      %38 = arith.maximumf %36, %37 : vector<8x128xf32>
      %c0_21 = arith.constant 0 : index
      %c0_22 = arith.constant 0 : index
      %39 = vector.load %arg8[%c0_21, %c0_22] : memref<8x128xf32, #tpu.memory_space<vmem>>, vector<8x128xf32>
      tpu.vector_store %arg8[%c0_21, %c0_22], %38 {strides = array<i32>} : memref<8x128xf32, #tpu.memory_space<vmem>>, vector<8x128xf32>,
    } else {
    }
    %c0 = arith.constant 0 : index
    %c0_1 = arith.constant 0 : index
    %3 = vector.load %arg8[%c0, %c0_1] : memref<8x128xf32, #tpu.memory_space<vmem>>, vector<8x128xf32>
    %c0_2 = arith.constant 0 : index
    %c0_3 = arith.constant 0 : index
    %4 = vector.load %arg5[%c0_2, %c0_3] : memref<128x128xf32, #tpu.memory_space<vmem>>, vector<128x128xf32>
    %cst = arith.constant dense<0.000000e+00> : vector<8x128xf32>
    %5 = tpu.matmul %3, %4, %cst {dimension_numbers = #tpu.dot_dimension_numbers<[1], [0], [0], [1], [0, 0, 1, 1], [], []>} : vector<8x128xf32>, vector<128x128xf32>, vector<8x128xf32> -> vector<8x128xf32>
    %c0_4 = arith.constant 0 : index
    %c0_5 = arith.constant 0 : index
    %6 = vector.load %arg6[%c0_4, %c0_5] : memref<1x128xf32, #tpu.memory_space<vmem>>, vector<1x128xf32>
    %7 = vector.broadcast %6 : vector<1x128xf32> to vector<8x128xf32>
    %8 = arith.addf %5, %7 : vector<8x128xf32>
    %c0_6 = arith.constant 0 : index
    %c0_7 = arith.constant 0 : index
    %9 = vector.load %arg7[%c0_6, %c0_7] : memref<8x128xf32, #tpu.memory_space<vmem>>, vector<8x128xf32>
    tpu.vector_store %arg7[%c0_6, %c0_7], %8 {strides = array<i32>} : memref<8x128xf32, #tpu.memory_space<vmem>>, vector<8x128xf32>,
    return
  }
  func.func @transform_0(%arg0: i32, %arg1: i32) -> (i32, i32) {
    %c0_i32 = arith.constant 0 : i32
    %c0_i32_0 = arith.constant 0 : i32
    return %arg0, %c0_i32 : i32, i32
  }
  func.func @transform_1(%arg0: i32, %arg1: i32) -> (i32, i32) {
    %c0_i32 = arith.constant 0 : i32
    %c0_i32_0 = arith.constant 0 : i32
    %c0_i32_1 = arith.constant 0 : i32
    return %c0_i32, %c0_i32_0 : i32, i32
  }
  func.func @transform_2(%arg0: i32, %arg1: i32) -> (i32, i32) {
    %c0_i32 = arith.constant 0 : i32
    %c0_i32_0 = arith.constant 0 : i32
    %c0_i32_1 = arith.constant 0 : i32
    return %c0_i32, %c0_i32_0 : i32, i32
  }
  func.func @transform_3(%arg0: i32, %arg1: i32) -> (i32, i32) {
    %c0_i32 = arith.constant 0 : i32
    %c0_i32_0 = arith.constant 0 : i32
    return %c0_i32, %arg1 : i32, i32
  }
  func.func @transform_4(%arg0: i32, %arg1: i32) -> (i32, i32) {
    %c0_i32 = arith.constant 0 : i32
    %c0_i32_0 = arith.constant 0 : i32
    return %c0_i32, %arg1 : i32, i32
  }
  func.func @transform_5(%arg0: i32, %arg1: i32) -> (i32, i32) {
    %c0_i32 = arith.constant 0 : i32
    return %arg0, %arg1 : i32, i32
  }
}

</mosaic_0001>

<bundles_post_ra>
// kernel: tpu_custom_call.1
= control target key start
LH: loop header
LB: loop body
LE: loop exit
PB: predicated region body
PF: predicated region fallthrough
CT: control target
= control target key end

     0   :  { %10 = vsyncpa [#allocation4], 0  ;;  %s386_s0 = inlined_call_operand.hbm [shape: f32[8,128], index: 0, kind: input, shape index: {}]   ;;  %s387_s1 = inlined_call_operand.vmem [shape: f32[1,128], index: 1, kind: input, shape index: {}]   ;;  %s388_s2 = inlined_call_operand.vmem [shape: f32[1,128], index: 2, kind: input, shape index: {}]   ;;  %s389_s3 = inlined_call_operand.hbm [shape: f32[128,128], index: 3, kind: input, shape index: {}]   ;;  %s390_s4 = inlined_call_operand.vmem [shape: f32[1,128], index: 4, kind: input, shape index: {}]   ;;  %s391_s5 = inlined_call_operand.hbm [shape: f32[8,128], index: 5, kind: output, shape index: {}]  }
   0x1   :  { %11 = vsyncpa [#allocation7], 0 }
   0x2   :  { %12 = vsyncpa [#allocation5], 0  ;;  %s325_s18 = smov [#allocation3]   ;;  %s326_s20 = smov [#allocation6]  }
   0x3   :  { %s19_s19 = sshll.u32 %s325_s18, 4  ;;  %s32_s21 = sshll.u32 %s326_s20, 4  ;;  %s20_s19 = int_to_ptr.vmem [resolvable:$true] %s19_s19  ;;  %s33_s21 = int_to_ptr.vmem [resolvable:$true] %s32_s21 }
   0x4   :  { %s267_s22 = scalar_lea.vmem %s20_s19, 128  ;;  %p272_p1 = scmp.lt.s32.totalorder %s20_s19, %s20_s19 }
   0x5   :  { %p268_p0 = scmp.ne.s32.totalorder %s20_s19, %s267_s22  ;;  %p273_p2 = scmp.lt.s32.totalorder %s267_s22, %s267_s22 }
   0x7   :  { %p274_p3 = por %p273_p2, %p272_p1 }
   0x9   :  { %p275_p4 = pnand %p274_p3, %p268_p0 }
   0xb   :  { %278 = shalt.err (!%p275_p4)
}
   0xc   :  { %22 = dma.hbm_to_vmem [thread:$0]  %s386_s0, 128, %s20_s19, [#allocation4]  }
   0xd   :  { %s287_s25 = scalar_lea.vmem %s33_s21, 2048  ;;  %p292_p6 = scmp.lt.s32.totalorder %s33_s21, %s33_s21 }
   0xe   :  { %p288_p5 = scmp.ne.s32.totalorder %s33_s21, %s287_s25  ;;  %p293_p7 = scmp.lt.s32.totalorder %s287_s25, %s287_s25 }
  0x10   :  { %p294_p8 = por %p293_p7, %p292_p6 }
  0x12   :  { %p295_p9 = pnand %p294_p8, %p288_p5 }
  0x14   :  { %298 = shalt.err (!%p295_p9)
}
  0x15   :  { %s327_s26 = smov 128   ;;  %s328_s27 = smov 8  }
  0x16   :  { %38 = dma.hbm_to_vmem [thread:$0]  %s389_s3, 2048, %s33_s21, [#allocation7], %s327_s26, %s327_s26, %s328_s27  }
  0x17   :  { %319 = dma.done.wait [#allocation4], 128  }
  0x18   :  { %320 = vsyncadd [#allocation4], 4294967168 }
  0x19   :  { %321 = dma.done.wait [#allocation7], 2048  }
  0x1a   :  { %322 = vsyncadd [#allocation7], 4294965248  ;;  %v368_v0 = vld [vmem:[#allocation3] sm:$0xff]  ;;  %v329_v2 = vmov 0.0   ;;  %v99_v4 = vld [vmem:[#allocation6 + $0x70] sm:$0xff]  ;;  %vm330_vm0 = vmmov 0  }
  0x1b   :  { %52 = vadd.xlane.f32.xlu0 %v368_v0  ;;  %v55_v1 = vmul.f32 %v368_v0, %v368_v0  ;;  %215 = vmatprep.subr.mxu0 %v329_v2  ;;  %v100_v3 = vld [vmem:[#allocation6 + $0x78] sm:$0xff]  ;;  %v98_v5 = vld [vmem:[#allocation6 + $0x68] sm:$0xff]  ;;  %v97_v6 = vld [vmem:[#allocation6 + $0x60] sm:$0xff]  ;;  %s331_s9 = smov [#allocation8]  }
  0x1c   :  { %216 = vmatpush3.msra.mxu0 %v100_v3  ;;  %v96_v7 = vld [vmem:[#allocation6 + $0x58] sm:$0xff]  ;;  %v95_v8 = vld [vmem:[#allocation6 + $0x50] sm:$0xff]  ;;  %v94_v9 = vld [vmem:[#allocation6 + $0x48] sm:$0xff]  ;;  %247 = vmatprep.mubr.msk.f32.mxu0 %vm330_vm0, %v329_v2  ;;  %s185_s10 = sshll.u32 %s331_s9, 4  ;;  %s186_s10 = int_to_ptr.vmem [resolvable:$true] %s185_s10 }
  0x1d   :  { %217 = vmatprep.subr.mxu0 %v329_v2  ;;  %v93_v10 = vld [vmem:[#allocation6 + $0x40] sm:$0xff]  ;;  %v92_v11 = vld [vmem:[#allocation6 + $0x38] sm:$0xff]  ;;  %v91_v12 = vld [vmem:[#allocation6 + $0x30] sm:$0xff]  ;;  %p304_p11 = scmp.lt.s32.totalorder %s186_s10, %s186_s10 }
  0x1e   :  { %218 = vmatpush3.msra.mxu0 %v99_v4  ;;  %v90_v13 = vld [vmem:[#allocation6 + $0x28] sm:$0xff]  ;;  %v89_v14 = vld [vmem:[#allocation6 + $0x20] sm:$0xff]  ;;  %v88_v15 = vld [vmem:[#allocation6 + $0x18] sm:$0xff] }
  0x1f   :  { %56 = vadd.xlane.f32.xlu0 %v55_v1  ;;  %219 = vmatprep.subr.mxu0 %v329_v2  ;;  %v87_v16 = vld [vmem:[#allocation6 + $0x10] sm:$0xff]  ;;  %v86_v17 = vld [vmem:[#allocation6 + $0x8] sm:$0xff]  ;;  %v85_v18 = vld [vmem:[#allocation6] sm:$0xff] }
  0x20   :  { %220 = vmatpush3.msra.mxu0 %v98_v5  ;;  %v195_v29 = vld [vmem:[%s387_s1] ss:$0 sm:$0xff]  ;;  %s299_s1 = scalar_lea.vmem %s186_s10, 128 }
  0x21   :  { %221 = vmatprep.subr.mxu0 %v329_v2  ;;  %v196_v31 = vld [vmem:[%s388_s2] ss:$0 sm:$0xff]  ;;  %p300_p10 = scmp.ne.s32.totalorder %s186_s10, %s299_s1  ;;  %p305_p12 = scmp.lt.s32.totalorder %s299_s1, %s299_s1 }
  0x22   :  { %222 = vmatpush3.msra.mxu0 %v97_v6  ;;  %v197_v35 = vld [vmem:[%s390_s4] ss:$0 sm:$0xff] }
  0x23   :  { %223 = vmatprep.subr.mxu0 %v329_v2  ;;  %p306_p13 = por %p305_p12, %p304_p11 }
  0x24   :  { %224 = vmatpush3.msra.mxu0 %v96_v7 }
  0x25   :  { %225 = vmatprep.subr.mxu0 %v329_v2  ;;  %p307_p0 = pnand %p306_p13, %p300_p10 }
  0x26   :  { %226 = vmatpush3.msra.mxu0 %v95_v8 }
  0x27   :  { %227 = vmatprep.subr.mxu0 %v329_v2 }
  0x28   :  { %228 = vmatpush3.msra.mxu0 %v94_v9 }
  0x29   :  { %229 = vmatprep.subr.mxu0 %v329_v2 }
  0x2a   :  { %230 = vmatpush3.msra.mxu0 %v93_v10 }
  0x2b   :  { %231 = vmatprep.subr.mxu0 %v329_v2 }
  0x2c   :  { %232 = vmatpush3.msra.mxu0 %v92_v11 }
  0x2d   :  { %233 = vmatprep.subr.mxu0 %v329_v2 }
  0x2e   :  { %234 = vmatpush3.msra.mxu0 %v91_v12 }
  0x2f   :  { %235 = vmatprep.subr.mxu0 %v329_v2 }
  0x30   :  { %236 = vmatpush3.msra.mxu0 %v90_v13 }
  0x31   :  { %237 = vmatprep.subr.mxu0 %v329_v2 }
  0x32   :  { %238 = vmatpush3.msra.mxu0 %v89_v14 }
  0x33   :  { %239 = vmatprep.subr.mxu0 %v329_v2 }
  0x34   :  { %240 = vmatpush3.msra.mxu0 %v88_v15 }
  0x35   :  { %241 = vmatprep.subr.mxu0 %v329_v2 }
  0x36   :  { %242 = vmatpush3.msra.mxu0 %v87_v16 }
  0x37   :  { %243 = vmatprep.subr.mxu0 %v329_v2 }
  0x38   :  { %244 = vmatpush3.msra.mxu0 %v86_v17 }
  0x39   :  { %245 = vmatprep.subr.mxu0 %v329_v2 }
  0x3a   :  { %246 = vmatpush3.msra.mxu0 %v85_v18 }
  0xa4   :  { %v53_v19 = vpop.xlane.xlu0 %52 }
  0xa5   :  { %v54_v20 = vmul.f32 0.03125, %v53_v19 }
  0xa7   :  { %v59_v22 = vmul.f32 %v54_v20, %v54_v20  ;;  %v64_v27 = vsub.f32 %v368_v0, %v54_v20 }
  0xa8   :  { %v57_v21 = vpop.xlane.xlu0 %56 }
  0xa9   :  { %v58_v23 = vmul.f32 0.03125, %v57_v21 }
  0xab   :  { %v60_v24 = vsub.f32 %v58_v23, %v59_v22 }
  0xad   :  { %v61_v25 = vmax.f32 %v60_v24, 0.0 }
  0xaf   :  { %v62_v26 = vadd.f32 1e-05, %v61_v25 }
  0xb1   :  { %257 = vrsqrt.f32 %v62_v26 }
  0xbe   :  { %v258_v28 = vpop.eup %257 }
  0xbf   :  { %v65_v30 = vmul.f32 %v258_v28, %v64_v27 }
  0xc1   :  { %v73_v32 = vmul.f32 %v195_v29, %v65_v30 }
  0xc3   :  { %v81_v33 = vadd.f32 %v196_v31, %v73_v32 }
  0xc5   :  { %v82_v34 = vmax.f32 %v81_v33, 0.0 }
  0xc7   :  { %248 = vmatmul.mubr.f32.vlgmr.msra.gmra.mxu0 %v82_v34 }
 0x187   :  { %v174_v36 = vpop.f32.mrf.mxu0 }
 0x188   :  { %v175_v37 = vadd.f32 %v197_v35, %v174_v36 }
 0x189   :  { %v249_v38 = vpop.f32.mrf.mxu0 }
 0x18a   :  { %178 = vst [vmem:[#allocation8] sm:$0xff] %v175_v37 }
 0x18b   :  { %310 = shalt.err (!%p307_p0)
}
 0x18c   :  { %188 = dma.vmem_to_hbm [thread:$0]  %s186_s10, 128, %s391_s5, [#allocation5]  }
 0x18d   :  { %323 = dma.done.wait [#allocation5], 128  }
 0x18e   :  { %324 = vsyncadd [#allocation5], 4294967168 }
 0x18f   :  { %192 = vsyncpa [#allocation4], 1 }
 0x190   :  { %193 = vsyncpa [#allocation7], 1 }
 0x191   :  { %194 = vsyncpa [#allocation5], 1 }

</bundles_post_ra>
